<compile_context>
chip_gen: v5e
topology: v5e:2x2
jax: 0.10.0
libtpu: 0.0.40
codegen_flags: <defaults>
</compile_context>

<pallas_src>
import jax
import jax.numpy as jnp
from jax.experimental import pallas as pl
from jax.experimental.pallas import tpu as pltpu

BN_EPS = 1e-5

# Rows of the packed lane-dense parameter slab (8, L) f32.
_ROW_B1, _ROW_GAMMA, _ROW_BETA, _ROW_B2, _ROW_W3, _ROW_B3 = 0, 1, 2, 3, 4, 5


def critic_kernel(s_ref, a_ref, w1s_ref, w1a_ref, w2_ref, p_ref, out_ref):
    B = s_ref.shape[0]
    f1 = w1s_ref.shape[1]
    f2 = w2_ref.shape[1]
    inv_b = 1.0 / B

    # --- fcs1 on the (states, actions) pair: two MXU matmuls against the
    #     pre-split w1 (no concat, second matmul hides under the first's
    #     latency).  bf16 operands, f32 accumulation.  + bias, ReLU.
    h1 = jnp.dot(s_ref[...], w1s_ref[...], preferred_element_type=jnp.float32)
    h1 = h1 + jnp.dot(a_ref[...], w1a_ref[...],
                      preferred_element_type=jnp.float32)
    h1 = jnp.maximum(h1 + p_ref[_ROW_B1:_ROW_B1 + 1, :f1], 0.0)

    # --- BatchNorm1d (training mode, biased variance), single pass over h1:
    #     sum & sum-of-squares, var = E[x^2]-mean^2 clamped at 0, affine
    #     folded into one (scale, shift) pair -> 2 VPU ops/elem.
    s = jnp.sum(h1, axis=0, keepdims=True)
    ss = jnp.sum(h1 * h1, axis=0, keepdims=True)
    mean = s * inv_b
    var = jnp.maximum(ss * inv_b - mean * mean, 0.0)
    inv_std = jax.lax.rsqrt(var + BN_EPS)
    scale = p_ref[_ROW_GAMMA:_ROW_GAMMA + 1, :f1] * inv_std
    shift = p_ref[_ROW_BETA:_ROW_BETA + 1, :f1] - mean * scale
    h1 = h1 * scale + shift

    # --- fc2 + ReLU (bf16 operands, f32 accumulation)
    h2 = jnp.dot(h1.astype(jnp.bfloat16), w2_ref[...],
                 preferred_element_type=jnp.float32)
    h2 = jnp.maximum(h2 + p_ref[_ROW_B2:_ROW_B2 + 1, :f2], 0.0)

    # --- fc3 (output width 1): lane-dense VPU multiply + XLU lane reduction
    #     against the (1, f2) weight row; scalar bias read from the slab.
    w3_row = p_ref[_ROW_W3:_ROW_W3 + 1, :f2]
    out_ref[...] = (jnp.sum(h2 * w3_row, axis=-1, keepdims=True)
                    + p_ref[_ROW_B3:_ROW_B3 + 1, 0:1])


def prepare_params(params, states_dim):
    """One-time packing of module parameters for the kernel.

    Call OUTSIDE the training step.  Returns:
      w1_s (S_dim, F1) bf16, w1_a (A_dim, F1) bf16, w2 (F1, F2) bf16,
      slab (8, L) f32 holding b1 / gamma / beta / b2 / w3 / b3 as lane-dense
      rows (zero padded to L = multiple of 128 lanes).
    """
    w1, b1, gamma, beta, w2, b2, w3, b3 = params
    f1 = w1.shape[1]
    f2 = w2.shape[1]
    L = ((max(f1, f2, 128) + 127) // 128) * 128

    def row(v):
        v = jnp.asarray(v, jnp.float32).reshape(-1)
        return jnp.zeros((L,), jnp.float32).at[:v.shape[0]].set(v)

    slab = jnp.zeros((8, L), jnp.float32)
    slab = slab.at[_ROW_B1].set(row(b1))
    slab = slab.at[_ROW_GAMMA].set(row(gamma))
    slab = slab.at[_ROW_BETA].set(row(beta))
    slab = slab.at[_ROW_B2].set(row(b2))
    slab = slab.at[_ROW_W3].set(row(w3))
    slab = slab.at[_ROW_B3].set(row(b3))

    return (
        w1[:states_dim].astype(jnp.bfloat16),   # (S_dim, F1)
        w1[states_dim:].astype(jnp.bfloat16),   # (A_dim, F1)
        w2.astype(jnp.bfloat16),                # (F1, F2)
        slab,                                   # (8, L) f32
    )


def maddpg_critic_forward(states_1d, actions_1d, prepared):
    w1s, w1a, w2, slab = prepared
    B = states_1d.shape[0]
    d_s, f1 = w1s.shape
    d_a = w1a.shape[0]
    f2 = w2.shape[1]

    # bf16 activation inputs: halves the only per-call DMA that scales with B;
    # the MXU consumes bf16 anyway (f32 accumulation inside the kernel).
    s = states_1d.astype(jnp.bfloat16)
    a = actions_1d.astype(jnp.bfloat16)

    vmem = pl.BlockSpec(memory_space=pltpu.MemorySpace.VMEM)

    # Advisory cost so XLA can schedule around this tiny custom call.
    flops = 2 * B * ((d_s + d_a) * f1 + f1 * f2 + f2) + 12 * B * f1
    bytes_accessed = (2 * B * (d_s + d_a)          # states + actions (bf16)
                      + 2 * (d_s + d_a) * f1       # w1 split (bf16)
                      + 2 * f1 * f2                # w2 (bf16)
                      + 4 * slab.size              # packed small params
                      + 4 * B)                     # output
    cost = pl.CostEstimate(flops=flops, transcendentals=f1,
                           bytes_accessed=bytes_accessed)

    # Gridless: whole batch resident in VMEM (correct BatchNorm over the full
    # batch; per-grid-step overhead would dominate at small B).
    # TODO(synk): for batches in the thousands (v7x), add a batch-tiled grid
    # (256-512 rows/tile) with two-phase BatchNorm, mark the batch axis
    # "parallel" to engage the second TensorCore, and emit a lane-dense (1, B)
    # output reshaped in the wrapper; keep v5e/v6e gridless up to ~B=512.
    return pl.pallas_call(
        critic_kernel,
        out_shape=jax.ShapeDtypeStruct((B, 1), jnp.float32),
        in_specs=[vmem] * 6,
        out_specs=vmem,
        cost_estimate=cost,
    )(s, a, w1s, w1a, w2, slab)


def init_params(key, num_agents, state_size, action_size, fcs1_units, fc2_units):
    """Deterministic init mirroring the module's reset_parameters() (f32)."""
    in1 = num_agents * (state_size + action_size)
    k = jax.random.split(key, 6)

    def uniform(kk, shape, lim):
        return jax.random.uniform(kk, shape, jnp.float32, -lim, lim)

    lim1 = 1.0 / jnp.sqrt(in1)          # hidden_init(fcs1)
    lim2 = 1.0 / jnp.sqrt(fcs1_units)   # hidden_init(fc2)

    w1 = uniform(k[0], (in1, fcs1_units), lim1)        # (in, out) layout
    b1 = uniform(k[1], (fcs1_units,), lim1)            # default Linear bias init
    w2 = uniform(k[2], (fcs1_units, fc2_units), lim2)
    b2 = uniform(k[3], (fc2_units,), lim2)
    w3 = uniform(k[4], (fc2_units, 1), 3e-3)
    b3 = uniform(k[5], (1,), 1.0 / jnp.sqrt(fc2_units))

    gamma = jnp.ones((fcs1_units,), jnp.float32)        # BatchNorm1d weight
    beta = jnp.zeros((fcs1_units,), jnp.float32)        # BatchNorm1d bias
    return (w1, b1, gamma, beta, w2, b2, w3, b3)


def reference_forward(states_1d, actions_1d, params):
    """Pure-f32 reference matching the PyTorch module forward (training mode)."""
    w1, b1, gamma, beta, w2, b2, w3, b3 = params
    x = jnp.concatenate([states_1d, actions_1d], axis=1)
    h1 = jnp.maximum(x @ w1 + b1, 0.0)
    mean = jnp.mean(h1, axis=0, keepdims=True)
    var = jnp.mean((h1 - mean) ** 2, axis=0, keepdims=True)
    h1 = (h1 - mean) * jax.lax.rsqrt(var + BN_EPS) * gamma + beta
    h2 = jnp.maximum(h1 @ w2 + b2, 0.0)
    return h2 @ w3 + b3


if __name__ == "__main__":
    # Small shapes consistent with the module's forward.
    num_agents, state_size, action_size = 2, 12, 4
    fcs1_units, fc2_units = 128, 64
    batch = 8

    key = jax.random.PRNGKey(0)
    kp, ks, ka = jax.random.split(key, 3)

    params = init_params(kp, num_agents, state_size, action_size,
                         fcs1_units, fc2_units)
    # One-time pack (outside the step): split w1 at the states/actions
    # boundary, bf16 matmul weights, single (8, 128) f32 slab for the rest.
    prepared = prepare_params(params, states_dim=num_agents * state_size)

    states_1d = jax.random.normal(ks, (batch, num_agents * state_size), jnp.float32)
    actions_1d = jax.random.normal(ka, (batch, num_agents * action_size), jnp.float32)

    q = maddpg_critic_forward(states_1d, actions_1d, prepared)
    q = jax.block_until_ready(q)

    q_ref = reference_forward(states_1d, actions_1d, params)
    assert q.shape == (batch, 1)
    # bf16 matmul operands (f32 accumulation) -> tolerance relaxed vs. pure f32.
    assert jnp.allclose(q, q_ref, atol=1e-2, rtol=1e-2), "mismatch vs reference"

    # TODO(synk): PyTorch BatchNorm1d training mode also updates
    # running_mean/running_var as a side effect; the kernel computes batch
    # stats only (forward value is identical, eval-mode stats are not tracked).

    print("KERNEL_OK")
</pallas_src>

<mosaic_0001>
module attributes {stable_mosaic.version = 11 : i64} {
  func.func @critic_kernel(%arg0: memref<8x24xbf16, #tpu.memory_space<vmem>>, %arg1: memref<8x8xbf16, #tpu.memory_space<vmem>>, %arg2: memref<24x128xbf16, #tpu.memory_space<vmem>>, %arg3: memref<8x128xbf16, #tpu.memory_space<vmem>>, %arg4: memref<128x64xbf16, #tpu.memory_space<vmem>>, %arg5: memref<8x128xf32, #tpu.memory_space<vmem>>, %arg6: memref<8x1xf32, #tpu.memory_space<vmem>>) attributes {dimension_semantics = [], scalar_prefetch = 0 : i64, scratch_operands = 0 : i64, tpu.core_type = #tpu.core_type<tc>} {
    %c0 = arith.constant 0 : index
    %c0_0 = arith.constant 0 : index
    %0 = vector.load %arg0[%c0, %c0_0] : memref<8x24xbf16, #tpu.memory_space<vmem>>, vector<8x24xbf16>
    %c0_1 = arith.constant 0 : index
    %c0_2 = arith.constant 0 : index
    %1 = vector.load %arg2[%c0_1, %c0_2] : memref<24x128xbf16, #tpu.memory_space<vmem>>, vector<24x128xbf16>
    %cst = arith.constant dense<0.000000e+00> : vector<8x128xf32>
    %2 = tpu.matmul %0, %1, %cst {dimension_numbers = #tpu.dot_dimension_numbers<[1], [0], [0], [1], [0, 0, 1, 1], [], []>} : vector<8x24xbf16>, vector<24x128xbf16>, vector<8x128xf32> -> vector<8x128xf32>
    %c0_3 = arith.constant 0 : index
    %c0_4 = arith.constant 0 : index
    %3 = vector.load %arg1[%c0_3, %c0_4] : memref<8x8xbf16, #tpu.memory_space<vmem>>, vector<8x8xbf16>
    %c0_5 = arith.constant 0 : index
    %c0_6 = arith.constant 0 : index
    %4 = vector.load %arg3[%c0_5, %c0_6] : memref<8x128xbf16, #tpu.memory_space<vmem>>, vector<8x128xbf16>
    %cst_7 = arith.constant dense<0.000000e+00> : vector<8x128xf32>
    %5 = tpu.matmul %3, %4, %cst_7 {dimension_numbers = #tpu.dot_dimension_numbers<[1], [0], [0], [1], [0, 0, 1, 1], [], []>} : vector<8x8xbf16>, vector<8x128xbf16>, vector<8x128xf32> -> vector<8x128xf32>
    %6 = arith.addf %2, %5 : vector<8x128xf32>
    %c0_8 = arith.constant 0 : index
    %c0_9 = arith.constant 0 : index
    %7 = vector.load %arg5[%c0_8, %c0_9] : memref<8x128xf32, #tpu.memory_space<vmem>>, vector<1x128xf32>
    %8 = vector.broadcast %7 : vector<1x128xf32> to vector<8x128xf32>
    %9 = arith.addf %6, %8 : vector<8x128xf32>
    %cst_10 = arith.constant 0.000000e+00 : f32
    %10 = vector.broadcast %cst_10 : f32 to vector<8x128xf32>
    %11 = arith.maximumf %9, %10 : vector<8x128xf32>
    %cst_11 = arith.constant dense<0.000000e+00> : vector<128xf32>
    %12 = vector.multi_reduction <add>, %11, %cst_11 [0] : vector<8x128xf32> to vector<128xf32>
    %13 = vector.shape_cast %12 : vector<128xf32> to vector<1x128xf32>
    %14 = arith.mulf %11, %11 : vector<8x128xf32>
    %cst_12 = arith.constant dense<0.000000e+00> : vector<128xf32>
    %15 = vector.multi_reduction <add>, %14, %cst_12 [0] : vector<8x128xf32> to vector<128xf32>
    %16 = vector.shape_cast %15 : vector<128xf32> to vector<1x128xf32>
    %cst_13 = arith.constant 1.250000e-01 : f32
    %17 = vector.broadcast %cst_13 : f32 to vector<1x128xf32>
    %18 = arith.mulf %13, %17 : vector<1x128xf32>
    %cst_14 = arith.constant 1.250000e-01 : f32
    %19 = vector.broadcast %cst_14 : f32 to vector<1x128xf32>
    %20 = arith.mulf %16, %19 : vector<1x128xf32>
    %21 = arith.mulf %18, %18 : vector<1x128xf32>
    %22 = arith.subf %20, %21 : vector<1x128xf32>
    %cst_15 = arith.constant 0.000000e+00 : f32
    %23 = vector.broadcast %cst_15 : f32 to vector<1x128xf32>
    %24 = arith.maximumf %22, %23 : vector<1x128xf32>
    %cst_16 = arith.constant 9.99999974E-6 : f32
    %25 = vector.broadcast %cst_16 : f32 to vector<1x128xf32>
    %26 = arith.addf %24, %25 : vector<1x128xf32>
    %27 = math.rsqrt %26 : vector<1x128xf32>
    %c1 = arith.constant 1 : index
    %c0_17 = arith.constant 0 : index
    %28 = vector.load %arg5[%c1, %c0_17] : memref<8x128xf32, #tpu.memory_space<vmem>>, vector<1x128xf32>
    %29 = arith.mulf %28, %27 : vector<1x128xf32>
    %c2 = arith.constant 2 : index
    %c0_18 = arith.constant 0 : index
    %30 = vector.load %arg5[%c2, %c0_18] : memref<8x128xf32, #tpu.memory_space<vmem>>, vector<1x128xf32>
    %31 = arith.mulf %18, %29 : vector<1x128xf32>
    %32 = arith.subf %30, %31 : vector<1x128xf32>
    %33 = vector.broadcast %29 : vector<1x128xf32> to vector<8x128xf32>
    %34 = arith.mulf %11, %33 : vector<8x128xf32>
    %35 = vector.broadcast %32 : vector<1x128xf32> to vector<8x128xf32>
    %36 = arith.addf %34, %35 : vector<8x128xf32>
    %37 = arith.truncf %36 : vector<8x128xf32> to vector<8x128xbf16>
    %c0_19 = arith.constant 0 : index
    %c0_20 = arith.constant 0 : index
    %38 = vector.load %arg4[%c0_19, %c0_20] : memref<128x64xbf16, #tpu.memory_space<vmem>>, vector<128x64xbf16>
    %cst_21 = arith.constant dense<0.000000e+00> : vector<8x64xf32>
    %39 = tpu.matmul %37, %38, %cst_21 {dimension_numbers = #tpu.dot_dimension_numbers<[1], [0], [0], [1], [0, 0, 1, 1], [], []>} : vector<8x128xbf16>, vector<128x64xbf16>, vector<8x64xf32> -> vector<8x64xf32>
    %c3 = arith.constant 3 : index
    %c0_22 = arith.constant 0 : index
    %40 = vector.load %arg5[%c3, %c0_22] : memref<8x128xf32, #tpu.memory_space<vmem>>, vector<1x64xf32>
    %41 = vector.broadcast %40 : vector<1x64xf32> to vector<8x64xf32>
    %42 = arith.addf %39, %41 : vector<8x64xf32>
    %cst_23 = arith.constant 0.000000e+00 : f32
    %43 = vector.broadcast %cst_23 : f32 to vector<8x64xf32>
    %44 = arith.maximumf %42, %43 : vector<8x64xf32>
    %c4 = arith.constant 4 : index
    %c0_24 = arith.constant 0 : index
    %45 = vector.load %arg5[%c4, %c0_24] : memref<8x128xf32, #tpu.memory_space<vmem>>, vector<1x64xf32>
    %46 = vector.broadcast %45 : vector<1x64xf32> to vector<8x64xf32>
    %47 = arith.mulf %44, %46 : vector<8x64xf32>
    %cst_25 = arith.constant dense<0.000000e+00> : vector<8xf32>
    %48 = vector.multi_reduction <add>, %47, %cst_25 [1] : vector<8x64xf32> to vector<8xf32>
    %49 = vector.shape_cast %48 : vector<8xf32> to vector<8x1xf32>
    %c5 = arith.constant 5 : index
    %c0_26 = arith.constant 0 : index
    %50 = vector.load %arg5[%c5, %c0_26] : memref<8x128xf32, #tpu.memory_space<vmem>>, vector<1x1xf32>
    %51 = vector.broadcast %50 : vector<1x1xf32> to vector<8x1xf32>
    %52 = arith.addf %49, %51 : vector<8x1xf32>
    %c0_27 = arith.constant 0 : index
    %c0_28 = arith.constant 0 : index
    %53 = vector.load %arg6[%c0_27, %c0_28] : memref<8x1xf32, #tpu.memory_space<vmem>>, vector<8x1xf32>
    tpu.vector_store %arg6[%c0_27, %c0_28], %52 {strides = array<i32>} : memref<8x1xf32, #tpu.memory_space<vmem>>, vector<8x1xf32>,
    return
  }
}

</mosaic_0001>

<bundles_post_ra>
// kernel: tpu_custom_call.1
= control target key start
LH: loop header
LB: loop body
LE: loop exit
PB: predicated region body
PF: predicated region fallthrough
CT: control target
= control target key end

     0   :  { %vm34_vm0 = vcmask 1043456   ;;  %vm30_vm1 = vcmask 64512   ;;  %vm60_vm2 = vcmask 195584   ;;  %vm206_vm6 = vcmask 523264   ;;  %s367_s3 = inlined_call_operand.vmem [shape: bf16[8,128], index: 3, kind: input, shape index: {}]   ;;  %s368_s1 = inlined_call_operand.vmem [shape: bf16[8,8], index: 1, kind: input, shape index: {}]   ;;  %s369_s2 = inlined_call_operand.vmem [shape: bf16[24,128], index: 2, kind: input, shape index: {}]   ;;  %s370_s0 = inlined_call_operand.vmem [shape: bf16[8,24], index: 0, kind: input, shape index: {}]   ;;  %s371_s5 = inlined_call_operand.vmem [shape: f32[8,128], index: 5, kind: input, shape index: {}]   ;;  %s372_s4 = inlined_call_operand.vmem [shape: bf16[128,64], index: 4, kind: input, shape index: {}]   ;;  %s373_s6 = inlined_call_operand.vmem [shape: f32[8,1], index: 6, kind: output, shape index: {}]  }
   0x1   :  { %v29_v0 = vld [vmem:[%s367_s3] sm:$0xf]  ;;  %v27_v1 = vld [vmem:[%s369_s2 + $0x8] sm:$0xf]  ;;  %v265_v9 = vld [vmem:[%s372_s4 + $0x38] sm:$0xff]  ;;  %vm213_vm7 = vcmask 7168  }
   0x2   :  { %v36_v2 = vsel %vm34_vm0, %v29_v0, 0  ;;  %v56_v3 = vunpack.c.l.b16 %v27_v1  ;;  %v28_v4 = vld [vmem:[%s368_s1] sm:$0xf]  ;;  %189 = vmatpush.bf16.msra.mxu2 %v265_v9  ;;  %v264_v10 = vld [vmem:[%s372_s4 + $0x30] sm:$0xff]  ;;  %v263_v11 = vld [vmem:[%s372_s4 + $0x28] sm:$0xff] }
   0x3   :  { %45 = vmatpush.bf16.msra.mxu0 %v36_v2  ;;  %v257_v7 = vld [vmem:[%s369_s2] sm:$0xff]  ;;  %v261_v14 = vld [vmem:[%s372_s4 + $0x18] sm:$0xff]  ;;  %v260_v19 = vld [vmem:[%s372_s4 + $0x10] sm:$0xff] }
   0x4   :  { %v58_v5 = vpack.c.b16 %v56_v3, %v56_v3  ;;  %v24_v8 = vld [vmem:[%s370_s0] sm:$0xf]  ;;  %v259_v22 = vld [vmem:[%s372_s4 + $0x8] sm:$0xff]  ;;  %v268_v0 = vld [vmem:[%s371_s5 + $0x4] ss:$0 sm:$0xff] }
   0x5   :  { %v262_v13 = vld [vmem:[%s372_s4 + $0x20] sm:$0xff] }
   0x6   :  { %219 = vmatmul.msk.bf16.vlgmr.msra.gmra.mxu0 %vm30_vm1, %v28_v4  ;;  %v65_v6 = vsel %vm34_vm0, %v58_v5, 0  ;;  %190 = vmatpush.bf16.msra.mxu2 %v264_v10  ;;  %v266_v15 = vld [vmem:[%s371_s5] ss:$0 sm:$0xff]  ;;  %v113_v50 = vld [vmem:[%s371_s5 + $0x1] sm:$0x1] }
   0x7   :  { %73 = vmatpush.bf16.msra.mxu1 %v65_v6  ;;  %v258_v28 = vld [vmem:[%s372_s4] sm:$0xff] }
   0x8   :  { %v115_v53 = vld [vmem:[%s371_s5 + $0x2] sm:$0x1]  ;;  %v267_v61 = vld [vmem:[%s371_s5 + $0x3] ss:$0 sm:$0xff]  ;;  %v269_v5 = vld [vmem:[%s371_s5 + $0x5] ss:$0 sm:$0xff] }
   0xa   :  { %191 = vmatpush.bf16.msra.mxu2 %v263_v11 }
   0xb   :  { %74 = vmatpush.bf16.msra.mxu1 %v257_v7 }
   0xe   :  { %224 = vmatmul.msk.bf16.vlgmr.msra.gmra.mxu1 %vm60_vm2, %v24_v8  ;;  %192 = vmatpush.bf16.msra.mxu2 %v262_v13 }
  0x12   :  { %193 = vmatpush.bf16.msra.mxu2 %v261_v14 }
  0x16   :  { %194 = vmatpush.bf16.msra.mxu2 %v260_v19 }
  0x1a   :  { %195 = vmatpush.bf16.msra.mxu2 %v259_v22 }
  0x1e   :  { %196 = vmatpush.bf16.msra.mxu2 %v258_v28 }
  0x83   :  { %v47_v12 = vpop.f32.mrf.mxu0 }
  0x8b   :  { %v49_v16 = vpop.f32.mrf.mxu0  ;;  %v76_v17 = vpop.f32.mrf.mxu1 }
  0x8c   :  { %v77_v18 = vadd.f32 %v76_v17, %v47_v12 }
  0x8e   :  { %v82_v20 = vadd.f32 %v266_v15, %v77_v18 }
  0x90   :  { %v83_v21 = vmax.f32 %v82_v20, 0.0 }
  0x92   :  { %v84_v23 = vrot.slane %v83_v21, 4  ;;  %v90_v24 = vmul.f32 %v83_v21, %v83_v21 }
  0x93   :  { %v78_v25 = vpop.f32.mrf.mxu1 }
  0x94   :  { %v85_v26 = vadd.f32 %v84_v23, %v83_v21  ;;  %v91_v27 = vrot.slane %v90_v24, 4 }
  0x96   :  { %v92_v29 = vadd.f32 %v91_v27, %v90_v24  ;;  %v86_v30 = vrot.slane %v85_v26, 2 }
  0x98   :  { %v93_v31 = vrot.slane %v92_v29, 2  ;;  %v87_v32 = vadd.f32 %v86_v30, %v85_v26 }
  0x9a   :  { %v94_v33 = vadd.f32 %v93_v31, %v92_v29  ;;  %v88_v34 = vrot.slane %v87_v32, 1 }
  0x9c   :  { %v89_v35 = vadd.f32 %v88_v34, %v87_v32  ;;  %v95_v36 = vrot.slane %v94_v33, 1 }
  0x9e   :  { %v96_v37 = vadd.f32 %v95_v36, %v94_v33  ;;  %v97_v38 = vmul.f32 0.125, %v89_v35 }
  0xa0   :  { %v98_v39 = vmul.f32 0.125, %v96_v37  ;;  %v99_v40 = vmul.f32 %v97_v38, %v97_v38 }
  0xa2   :  { %v100_v41 = vsub.f32 %v98_v39, %v99_v40 }
  0xa4   :  { %v101_v42 = vmax.f32 %v100_v41, 0.0 }
  0xa6   :  { %v102_v43 = vadd.f32 1e-05, %v101_v42 }
  0xa8   :  { %270 = vrsqrt.f32 %v102_v43  ;;  %vm109_vm4 = vweird.f32 %v102_v43 }
  0xae   :  { %v271_v44 = vpop.eup %270 }
  0xaf   :  { %v104_v45 = vmul.f32 %v271_v44, %v102_v43  ;;  %vm110_vm3 = vweird.f32 %v271_v44 }
  0xb0   :  { %vm111_vm5 = vmor %vm109_vm4, %vm110_vm3 }
  0xb1   :  { %v105_v46 = vmul.f32 %v271_v44, %v104_v45 }
  0xb3   :  { %v106_v47 = vmul.f32 0.5, %v105_v46 }
  0xb5   :  { %v107_v48 = vsub.f32 1.5, %v106_v47 }
  0xb7   :  { %v108_v49 = vmul.f32 %v271_v44, %v107_v48 }
  0xb9   :  { %v112_v51 = vsel %vm111_vm5, %v271_v44, %v108_v49 }
  0xba   :  { %v114_v52 = vmul.f32 %v113_v50, %v112_v51 }
  0xbc   :  { %v116_v54 = vmul.f32 %v114_v52, %v97_v38  ;;  %v118_v55 = vperm.slane %v114_v52, 0 }
  0xbe   :  { %v117_v56 = vsub.f32 %v115_v53, %v116_v54  ;;  %v119_v57 = vmul.f32 %v118_v55, %v83_v21 }
  0xc0   :  { %v120_v58 = vperm.slane %v117_v56, 0 }
  0xc2   :  { %v121_v59 = vadd.f32 %v120_v58, %v119_v57 }
  0xc4   :  { %v122_v60 = vpack.c.bf16 %v121_v59, %v121_v59 }
  0xc6   :  { %197 = vmatmul.bf16.vlgmr.msra.gmra.mxu2 %v122_v60 }
 0x149   :  { %v198_v62 = vpop.f32.mrf.mxu2 }
 0x14a   :  { %v199_v63 = vadd.f32 %v267_v61, %v198_v62 }
 0x14c   :  { %v202_v1 = vmax.f32 %v199_v63, 0.0 }
 0x14e   :  { %v205_v2 = vmul.f32 %v268_v0, %v202_v1 }
 0x150   :  { %v207_v3 = vsel %vm206_vm6, %v205_v2, 0.0 }
 0x151   :  { %v200_v4 = vpop.f32.mrf.mxu2  ;;  %208 = vadd.xlane.f32.xlu0 %v207_v3 }
 0x1c4   :  { %v209_v6 = vpop.xlane.xlu0 %208 }
 0x1c5   :  { %v212_v7 = vadd.f32 %v269_v5, %v209_v6 }
 0x1c7   :  { %214 = vst.msk [vmem:[%s373_s6] sm:$0xff] %vm213_vm7, %v212_v7 }

</bundles_post_ra>
